<compile_context>
chip_gen: v7x
topology: tpu7x:2x2x1
jax: 0.10.0
libtpu: 0.0.40
codegen_flags: <defaults>
</compile_context>

<pallas_src>
import functools

import jax
import jax.numpy as jnp
from jax import lax
from jax.experimental import pallas as pl
from jax.experimental.pallas import tpu as pltpu


def _head_kernel(x_ref, wqkv_ref, o_ref, *, scale, head_size):
    """One batch element: fused QKV projection + causal softmax attention.

    x_ref:    (T, C)   bf16
    wqkv_ref: (C, 3H)  bf16   columns are [Wq | Wk | Wv]
    o_ref:    (T, H)   f32
    """
    H = head_size

    # Fused projection: single lane-dense MXU matmul, bf16 operands, f32 accum.
    qkv = jnp.dot(x_ref[...], wqkv_ref[...],
                  preferred_element_type=jnp.float32)            # (T, 3H) f32

    # Fold the 1/sqrt(H) scale into q (touches T*H elements, not T*T).
    q = (qkv[:, 0 * H:1 * H] * scale).astype(jnp.bfloat16)       # (T, H)
    k = qkv[:, 1 * H:2 * H].astype(jnp.bfloat16)                 # (T, H)
    v = qkv[:, 2 * H:3 * H].astype(jnp.bfloat16)                 # (T, H)

    # Scores q @ k^T with the transpose folded into the dot_general contraction.
    wei = lax.dot_general(
        q, k,
        dimension_numbers=(((1,), (1,)), ((), ())),
        preferred_element_type=jnp.float32)                      # (T, T) f32

    # Causal mask: query position i may only attend to key positions j <= i.
    # (Safe with -inf because every row keeps its finite diagonal score.)
    T = wei.shape[0]
    row = lax.broadcasted_iota(jnp.int32, (T, T), 0)
    col = lax.broadcasted_iota(jnp.int32, (T, T), 1)
    wei = jnp.where(col <= row, wei, -jnp.inf)

    # Numerically stable softmax; all elementwise math in f32.
    wei = wei - jnp.max(wei, axis=-1, keepdims=True)
    p = jnp.exp(wei)
    p = p * pl.reciprocal(jnp.sum(p, axis=-1, keepdims=True), approx=True)

    # Weighted sum of values: bf16 MXU operands, f32 accumulation.
    out = jnp.dot(p.astype(jnp.bfloat16), v,
                  preferred_element_type=jnp.float32)            # (T, H)
    o_ref[...] = out.astype(o_ref.dtype)


def head_forward(x, wq, wk, wv):
    """x: (B, T, C) float32; wq/wk/wv: (C, H) float32 -> (B, T, H) float32."""
    B, T, C = x.shape
    H = wq.shape[1]
    scale = float(H) ** -0.5

    # Fuse the three projection weights and cast MXU operands to bf16.
    wqkv = jnp.concatenate([wq, wk, wv], axis=1).astype(jnp.bfloat16)  # (C, 3H)
    x_bf16 = x.astype(jnp.bfloat16)

    kernel = functools.partial(_head_kernel, scale=scale, head_size=H)

    return pl.pallas_call(
        kernel,
        out_shape=jax.ShapeDtypeStruct((B, T, H), x.dtype),
        grid_spec=pltpu.PrefetchScalarGridSpec(
            num_scalar_prefetch=0,
            grid=(B,),
            in_specs=[
                # One batch element per grid step; leading dim squeezed away.
                pl.BlockSpec((pl.Squeezed(), T, C), lambda b: (b, 0, 0)),
                # Fused QKV weight, resident across the whole grid.
                pl.BlockSpec((C, 3 * H), lambda b: (0, 0)),
            ],
            out_specs=pl.BlockSpec((pl.Squeezed(), T, H), lambda b: (b, 0, 0)),
        ),
        compiler_params=pltpu.CompilerParams(
            dimension_semantics=("parallel",)),
    )(x_bf16, wqkv)


def _reference(x, wq, wk, wv):
    """Pure-JAX f32 reference mirroring the PyTorch forward (eval mode)."""
    q = x @ wq
    k = x @ wk
    v = x @ wv
    H = k.shape[-1]
    wei = (q @ jnp.swapaxes(k, -2, -1)) * (H ** -0.5)
    T = x.shape[1]
    mask = jnp.tril(jnp.ones((T, T), dtype=bool))
    wei = jnp.where(mask[None, :, :], wei, -jnp.inf)
    wei = jax.nn.softmax(wei, axis=-1)
    return wei @ v


if __name__ == "__main__":
    # Small shapes consistent with the module: n_embd=384, one head of size 64.
    B, T = 2, 16
    n_embd = 384
    head_size = 64

    key = jax.random.PRNGKey(0)
    kx, kq, kk, kv = jax.random.split(key, 4)

    x = jax.random.normal(kx, (B, T, n_embd), dtype=jnp.float32)

    # Deterministic nn.Linear-style init: U(-1/sqrt(in), 1/sqrt(in)), bias=False.
    # Weights stored pre-transposed as (n_embd, head_size) so the kernel does x @ W.
    bound = 1.0 / (n_embd ** 0.5)
    wq = jax.random.uniform(kq, (n_embd, head_size), jnp.float32, -bound, bound)
    wk = jax.random.uniform(kk, (n_embd, head_size), jnp.float32, -bound, bound)
    wv = jax.random.uniform(kv, (n_embd, head_size), jnp.float32, -bound, bound)

    out = head_forward(x, wq, wk, wv)
    out = jax.block_until_ready(out)

    ref = _reference(x, wq, wk, wv)
    assert out.shape == (B, T, head_size)
    # bf16 MXU operands + approx reciprocal -> compare with a bf16-level tolerance.
    assert jnp.allclose(out, ref, atol=5e-2, rtol=5e-2), "mismatch vs reference"

    print("KERNEL_OK")
</pallas_src>

<mosaic_0001>
module attributes {stable_mosaic.version = 11 : i64} {
  func.func @_head_kernel(%arg0: i32, %arg1: memref<1x16x384xbf16, #tpu.memory_space<vmem>>, %arg2: memref<384x192xbf16, #tpu.memory_space<vmem>>, %arg3: memref<1x16x64xf32, #tpu.memory_space<vmem>>) attributes {dimension_semantics = [#tpu.dimension_semantics<parallel>], iteration_bounds = array<i64: 2>, scalar_prefetch = 0 : i64, scratch_operands = 0 : i64, tpu.core_type = #tpu.core_type<tc>, window_params = [{transform_indices = @transform_0, window_bounds = array<i64: 1, 16, 384>}, {pipeline_mode = #tpu.pipeline_mode<synchronous>, transform_indices = @transform_1, window_bounds = array<i64: 384, 192>}, {transform_indices = @transform_2, window_bounds = array<i64: 1, 16, 64>}]} {
    %c0 = arith.constant 0 : index
    %c0_0 = arith.constant 0 : index
    %c0_1 = arith.constant 0 : index
    %0 = vector.load %arg1[%c0, %c0_0, %c0_1] : memref<1x16x384xbf16, #tpu.memory_space<vmem>>, vector<1x16x384xbf16>
    %1 = vector.shape_cast %0 : vector<1x16x384xbf16> to vector<16x384xbf16>
    %c0_2 = arith.constant 0 : index
    %c0_3 = arith.constant 0 : index
    %2 = vector.load %arg2[%c0_2, %c0_3] : memref<384x192xbf16, #tpu.memory_space<vmem>>, vector<384x192xbf16>
    %cst = arith.constant dense<0.000000e+00> : vector<16x192xf32>
    %3 = tpu.matmul %1, %2, %cst {dimension_numbers = #tpu.dot_dimension_numbers<[1], [0], [0], [1], [0, 0, 1, 1], [], []>} : vector<16x384xbf16>, vector<384x192xbf16>, vector<16x192xf32> -> vector<16x192xf32>
    %4 = vector.extract_strided_slice %3 {offsets = [0, 0], sizes = [16, 64], strides = [1, 1]} : vector<16x192xf32> to vector<16x64xf32>
    %cst_4 = arith.constant 1.250000e-01 : f32
    %5 = vector.broadcast %cst_4 : f32 to vector<16x64xf32>
    %6 = arith.mulf %4, %5 : vector<16x64xf32>
    %7 = arith.truncf %6 : vector<16x64xf32> to vector<16x64xbf16>
    %8 = vector.extract_strided_slice %3 {offsets = [0, 64], sizes = [16, 64], strides = [1, 1]} : vector<16x192xf32> to vector<16x64xf32>
    %9 = arith.truncf %8 : vector<16x64xf32> to vector<16x64xbf16>
    %10 = vector.extract_strided_slice %3 {offsets = [0, 128], sizes = [16, 64], strides = [1, 1]} : vector<16x192xf32> to vector<16x64xf32>
    %11 = arith.truncf %10 : vector<16x64xf32> to vector<16x64xbf16>
    %cst_5 = arith.constant dense<0.000000e+00> : vector<16x16xf32>
    %12 = tpu.matmul %7, %9, %cst_5 {dimension_numbers = #tpu.dot_dimension_numbers<[1], [1], [0], [0], [0, 0, 1, 0], [], []>} : vector<16x64xbf16>, vector<16x64xbf16>, vector<16x16xf32> -> vector<16x16xf32>
    %13 = tpu.iota {dimensions = array<i32: 0>} : vector<16x16xi32>
    %14 = tpu.iota {dimensions = array<i32: 1>} : vector<16x16xi32>
    %15 = arith.cmpi sle, %14, %13 : vector<16x16xi32>
    %cst_6 = arith.constant 0xFF800000 : f32
    %16 = vector.broadcast %cst_6 : f32 to vector<16x16xf32>
    %17 = arith.select %15, %12, %16 : vector<16x16xi1>, vector<16x16xf32>
    %cst_7 = arith.constant dense<0xFF800000> : vector<16xf32>
    %18 = vector.multi_reduction <maximumf>, %17, %cst_7 [1] : vector<16x16xf32> to vector<16xf32>
    %19 = vector.shape_cast %18 : vector<16xf32> to vector<16x1xf32>
    %20 = vector.broadcast %19 : vector<16x1xf32> to vector<16x16xf32>
    %21 = arith.subf %17, %20 : vector<16x16xf32>
    %22 = math.exp %21 : vector<16x16xf32>
    %cst_8 = arith.constant dense<0.000000e+00> : vector<16xf32>
    %23 = vector.multi_reduction <add>, %22, %cst_8 [1] : vector<16x16xf32> to vector<16xf32>
    %24 = vector.shape_cast %23 : vector<16xf32> to vector<16x1xf32>
    %25 = tpu.reciprocal %24 {approx = true} : vector<16x1xf32> -> vector<16x1xf32>
    %26 = vector.broadcast %25 : vector<16x1xf32> to vector<16x16xf32>
    %27 = arith.mulf %22, %26 : vector<16x16xf32>
    %28 = arith.truncf %27 : vector<16x16xf32> to vector<16x16xbf16>
    %cst_9 = arith.constant dense<0.000000e+00> : vector<16x64xf32>
    %29 = tpu.matmul %28, %11, %cst_9 {dimension_numbers = #tpu.dot_dimension_numbers<[1], [0], [0], [1], [0, 0, 1, 1], [], []>} : vector<16x16xbf16>, vector<16x64xbf16>, vector<16x64xf32> -> vector<16x64xf32>
    %c0_10 = arith.constant 0 : index
    %c0_11 = arith.constant 0 : index
    %c0_12 = arith.constant 0 : index
    %30 = vector.load %arg3[%c0_10, %c0_11, %c0_12] : memref<1x16x64xf32, #tpu.memory_space<vmem>>, vector<1x16x64xf32>
    %31 = vector.shape_cast %30 : vector<1x16x64xf32> to vector<16x64xf32>
    %32 = vector.shape_cast %29 : vector<16x64xf32> to vector<1x16x64xf32>
    tpu.vector_store %arg3[%c0_10, %c0_11, %c0_12], %32 {strides = array<i32>} : memref<1x16x64xf32, #tpu.memory_space<vmem>>, vector<1x16x64xf32>,
    return
  }
  func.func @transform_0(%arg0: i32) -> (i32, i32, i32) {
    %c0_i32 = arith.constant 0 : i32
    %c0_i32_0 = arith.constant 0 : i32
    %c0_i32_1 = arith.constant 0 : i32
    return %arg0, %c0_i32, %c0_i32_0 : i32, i32, i32
  }
  func.func @transform_1(%arg0: i32) -> (i32, i32) {
    %c0_i32 = arith.constant 0 : i32
    %c0_i32_0 = arith.constant 0 : i32
    %c0_i32_1 = arith.constant 0 : i32
    return %c0_i32, %c0_i32_0 : i32, i32
  }
  func.func @transform_2(%arg0: i32) -> (i32, i32, i32) {
    %c0_i32 = arith.constant 0 : i32
    %c0_i32_0 = arith.constant 0 : i32
    %c0_i32_1 = arith.constant 0 : i32
    return %arg0, %c0_i32, %c0_i32_0 : i32, i32, i32
  }
}

</mosaic_0001>

<bundles_post_ra>
// kernel: tpu_custom_call.1
= control target key start
LH: loop header
LB: loop body
LE: loop exit
PB: predicated region body
PF: predicated region fallthrough
CT: control target
= control target key end

     0   :  { %7 = vsyncpa [#allocation3], 0  ;;  %s1312_s0 = inlined_call_operand.vmem [shape: bf16[2,16,384], index: 0, kind: input, shape index: {}]   ;;  %s1313_s1 = inlined_call_operand.vmem [shape: bf16[384,192], index: 1, kind: input, shape index: {}]   ;;  %s1314_s2 = inlined_call_operand.hbm [shape: f32[2,16,64], index: 2, kind: output, shape index: {}]  }
   0x1   :  { %9 = vsyncpa [#allocation3 + $0x1], 0  ;;  %s1049_s9 = smov 0   ;;  %s1051_s10 = smov 0  }
   0x2   :  { %s1053_s11 = smov 0   ;;  %s1055_s12 = smov 0  }
   0x3 LB: > { %s1070_s13 = sadd.s32 4294967295, %s1025_s12   ;;  %s748_s14 = sadd.s32 4294967294, %s1025_s12   ;;  %s1025_s12 = sphi %s1055_s12, %s1320_s12   ;;  %s1021_s11 = sphi %s1053_s11, %s1319_s11   ;;  %s1017_s10 = sphi %s1051_s10, %s1318_s10   ;;  %s1013_s9 = sphi %s1049_s9, %s1317_s9  }
   0x4   : > { %s1074_s15 = sadd.s32 1, %s1025_s12   ;;  %s69_s16 = sadd.s32 1, %s1021_s11 }
   0x5   : > { %s66_s17 = ssub.s32 %s1025_s12, %s1074_s15  ;;  %p79_p0 = scmp.ne.s32.totalorder %s1021_s11, %s1017_s10 }
   0x6   : > { %p67_p1 = scmp.eq.s32.totalorder %s66_s17, 0  ;;  %p80_p2 = scmp.eq.s32.totalorder %s1070_s13, 1 }
   0x7   : > { %p85_p3 = scmp.ne.s32.totalorder %s1017_s10, %s1013_s9  ;;  %p86_p4 = scmp.eq.s32.totalorder %s748_s14, 1 }
   0x8   : > { %s1085_s18 = scalar_select %p67_p1, %s1021_s11, %s69_s16  }
   0x9   : > { %p1087_p5 = por %p80_p2, %p79_p0  ;;  %p1091_p6 = por %p86_p4, %p85_p3 }
   0xa   : > { %p751_p7 = scmp.ge.s32.totalorder %s1025_s12, 1  ;;  %p115_p8 = scmp.lt.s32.totalorder %s1025_s12, 3 }
   0xc   : > { %p116_p9 = pnand %p751_p7, %p115_p8 }
   0xd   : > { %v879_v0 = vld [vmem:[%s1313_s1 + $0x4] ss:$8 sps:$4 sm:$0xff] (!%p116_p9)   ;;  %v881_v1 = vld [vmem:[%s1313_s1] ss:$8 sps:$4 sm:$0xff] (!%p116_p9)   ;;  %v1027_v2 = vmov (!%p116_p9), 0   ;;  %p137_p10 = scmp.lt.s32.totalorder (!%p116_p9), %s1070_s13, 1 }
   0xe   : > { %119 = sbr.rel (%p116_p9) target bundleno = 1181 (0x49d), region = 28  ;;  %526 = vmatprep.mubr.bf16.mxu1 (!%p116_p9), %v1027_v2  ;;  %451 = vmatprep.subr.bf16.mxu0 (!%p116_p9), %v879_v0  ;;  %v882_v3 = vld [vmem:[%s1313_s1 + $0x14] ss:$8 sps:$4 sm:$0xff] (!%p116_p9)   ;;  %v884_v4 = vld [vmem:[%s1313_s1 + $0x10] ss:$8 sps:$4 sm:$0xff] (!%p116_p9)   ;;  %v1028_v56 = vmov (!%p116_p9), 0.0  }
   0xf   : > { %452 = vmatpush1.bf16.msra.mxu0 (!%p116_p9), %v881_v1  ;;  %v885_v5 = vld [vmem:[%s1313_s1 + $0x24] ss:$8 sps:$4 sm:$0xff] (!%p116_p9)   ;;  %v887_v6 = vld [vmem:[%s1313_s1 + $0x20] ss:$8 sps:$4 sm:$0xff] (!%p116_p9)   ;;  %v888_v7 = vld [vmem:[%s1313_s1 + $0x34] ss:$8 sps:$4 sm:$0xff] (!%p116_p9)  }
  0x10   : > { %453 = vmatprep.subr.bf16.mxu0 (!%p116_p9), %v882_v3  ;;  %v890_v8 = vld [vmem:[%s1313_s1 + $0x30] ss:$8 sps:$4 sm:$0xff] (!%p116_p9)   ;;  %v903_v9 = vld [vmem:[%s1313_s1 + $0x104] ss:$8 sps:$4 sm:$0xff] (!%p116_p9)   ;;  %v905_v10 = vld [vmem:[%s1313_s1 + $0x100] ss:$8 sps:$4 sm:$0xff] (!%p116_p9)  }
  0x11   : > { %v891_v11 = vld [vmem:[%s1313_s1 + $0x44] ss:$8 sps:$4 sm:$0xff] (!%p116_p9)   ;;  %494 = vmatprep.subr.bf16.mxu1 (!%p116_p9), %v903_v9  ;;  %v909_v12 = vld [vmem:[%s1313_s1 + $0x114] ss:$8 sps:$4 sm:$0xff] (!%p116_p9)   ;;  %v911_v13 = vld [vmem:[%s1313_s1 + $0x110] ss:$8 sps:$4 sm:$0xff] (!%p116_p9)  }
  0x12   : > { %495 = vmatpush1.bf16.msra.mxu1 (!%p116_p9), %v905_v10  ;;  %v893_v14 = vld [vmem:[%s1313_s1 + $0x40] ss:$8 sps:$4 sm:$0xff] (!%p116_p9)   ;;  %v894_v15 = vld [vmem:[%s1313_s1 + $0x54] ss:$8 sps:$4 sm:$0xff] (!%p116_p9)   ;;  %v915_v16 = vld [vmem:[%s1313_s1 + $0x124] ss:$8 sps:$4 sm:$0xff] (!%p116_p9)  }
  0x13   : > { %454 = vmatpush1.bf16.msra.mxu0 (!%p116_p9), %v884_v4  ;;  %496 = vmatprep.subr.bf16.mxu1 (!%p116_p9), %v909_v12  ;;  %v917_v17 = vld [vmem:[%s1313_s1 + $0x120] ss:$8 sps:$4 sm:$0xff] (!%p116_p9)   ;;  %v896_v18 = vld [vmem:[%s1313_s1 + $0x50] ss:$8 sps:$4 sm:$0xff] (!%p116_p9)   ;;  %v921_v19 = vld [vmem:[%s1313_s1 + $0x134] ss:$8 sps:$4 sm:$0xff] (!%p116_p9)  }
  0x14   : > { %455 = vmatprep.subr.bf16.mxu0 (!%p116_p9), %v885_v5  ;;  %v897_v20 = vld [vmem:[%s1313_s1 + $0x64] ss:$8 sps:$4 sm:$0xff] (!%p116_p9)   ;;  %v923_v21 = vld [vmem:[%s1313_s1 + $0x130] ss:$8 sps:$4 sm:$0xff] (!%p116_p9)   ;;  %v899_v22 = vld [vmem:[%s1313_s1 + $0x60] ss:$8 sps:$4 sm:$0xff] (!%p116_p9)  }
  0x15   : > { %v927_v23 = vld [vmem:[%s1313_s1 + $0x144] ss:$8 sps:$4 sm:$0xff]   ;;  %s138_s29 = scalar_select %p137_p10, %s1070_s13, 1  ;;  %v900_v24 = vld [vmem:[%s1313_s1 + $0x74] ss:$8 sps:$4 sm:$0xff]   ;;  %vm1029_vm0 = vmmov 0  }
  0x16   : > { %497 = vmatpush1.bf16.msra.mxu1 %v911_v13  ;;  %v929_v25 = vld [vmem:[%s1313_s1 + $0x140] ss:$8 sps:$4 sm:$0xff]   ;;  %v902_v26 = vld [vmem:[%s1313_s1 + $0x70] ss:$8 sps:$4 sm:$0xff]   ;;  %v933_v27 = vld [vmem:[%s1313_s1 + $0x154] ss:$8 sps:$4 sm:$0xff]  }
  0x17   : > { %456 = vmatpush1.bf16.msra.mxu0 %v887_v6  ;;  %498 = vmatprep.subr.bf16.mxu1 %v915_v16  ;;  %s833_s16 = smul.u32 24, %s138_s29  ;;  %v906_v28 = vld [vmem:[%s1313_s1 + $0x84] ss:$8 sps:$4 sm:$0xff]   ;;  %v935_v29 = vld [vmem:[%s1313_s1 + $0x150] ss:$8 sps:$4 sm:$0xff]   ;;  %vm545_vm1 = vcmask 523264  }
  0x18   : > { %457 = vmatprep.subr.bf16.mxu0 %v888_v7  ;;  %v908_v30 = vld [vmem:[%s1313_s1 + $0x80] ss:$8 sps:$4 sm:$0xff]   ;;  %v939_v31 = vld [vmem:[%s1313_s1 + $0x164] ss:$8 sps:$4 sm:$0xff]   ;;  %v912_v32 = vld [vmem:[%s1313_s1 + $0x94] ss:$8 sps:$4 sm:$0xff]  }
  0x19   : > { %s1195_s30 = scalar_lea.vmem %s1312_s0, %s833_s16  ;;  %v941_v33 = vld [vmem:[%s1313_s1 + $0x160] ss:$8 sps:$4 sm:$0xff]   ;;  %v914_v35 = vld [vmem:[%s1313_s1 + $0x90] ss:$8 sps:$4 sm:$0xff]   ;;  %v945_v36 = vld [vmem:[%s1313_s1 + $0x174] ss:$8 sps:$4 sm:$0xff]  }
  0x1a   : > { %499 = vmatpush1.bf16.msra.mxu1 %v917_v17  ;;  %v954_v34 = vld [vmem:[%s1195_s30 + $0x4] ss:$12 sps:$4 sm:$0xff]   ;;  %v920_v39 = vld [vmem:[%s1313_s1 + $0xa0] ss:$8 sps:$4 sm:$0xff]   ;;  %v924_v40 = vld [vmem:[%s1313_s1 + $0xb4] ss:$8 sps:$4 sm:$0xff]  }
  0x1b   : > { %458 = vmatpush1.bf16.msra.mxu0 %v890_v8  ;;  %500 = vmatprep.subr.bf16.mxu1 %v921_v19  ;;  %v918_v37 = vld [vmem:[%s1313_s1 + $0xa4] ss:$8 sps:$4 sm:$0xff]   ;;  %v947_v38 = vld [vmem:[%s1313_s1 + $0x170] ss:$8 sps:$4 sm:$0xff]   ;;  %v951_v41 = vld [vmem:[%s1195_s30 + $0x8] ss:$12 sps:$4 sm:$0xff]   ;;  %v593_v8 = vlaneseq }
  0x1c   : > { %459 = vmatprep.subr.bf16.mxu0 %v891_v11  ;;  %483 = vmatprep.mubr.bf16.mxu0 %v954_v34  ;;  %v926_v42 = vld [vmem:[%s1313_s1 + $0xb0] ss:$8 sps:$4 sm:$0xff]   ;;  %v930_v43 = vld [vmem:[%s1313_s1 + $0xc4] ss:$8 sps:$4 sm:$0xff]   ;;  %v932_v44 = vld [vmem:[%s1313_s1 + $0xc0] ss:$8 sps:$4 sm:$0xff]  }
  0x1d   : > { %v936_v45 = vld [vmem:[%s1313_s1 + $0xd4] ss:$8 sps:$4 sm:$0xff]   ;;  %v938_v46 = vld [vmem:[%s1313_s1 + $0xd0] ss:$8 sps:$4 sm:$0xff]   ;;  %v942_v47 = vld [vmem:[%s1313_s1 + $0xe4] ss:$8 sps:$4 sm:$0xff]  }
  0x1e   : > { %501 = vmatpush1.bf16.msra.mxu1 %v923_v21  ;;  %v944_v48 = vld [vmem:[%s1313_s1 + $0xe0] ss:$8 sps:$4 sm:$0xff]   ;;  %v948_v49 = vld [vmem:[%s1313_s1 + $0xf4] ss:$8 sps:$4 sm:$0xff]   ;;  %v950_v50 = vld [vmem:[%s1313_s1 + $0xf0] ss:$8 sps:$4 sm:$0xff]  }
  0x1f   : > { %460 = vmatpush1.bf16.msra.mxu0 %v893_v14  ;;  %502 = vmatprep.subr.bf16.mxu1 %v927_v23  ;;  %v952_v51 = vld [vmem:[%s1195_s30] ss:$12 sps:$4 sm:$0xff]   ;;  %s1030_s30 = smov 64   ;;  %v594_v9 = vshrl.u32 %v593_v8, 7  ;;  %v597_v10 = vand.u32 127, %v593_v8  ;;  %vm602_vm3 = vcmask 130048  }
  0x20   : > { %461 = vmatprep.subr.bf16.mxu0 %v894_v15  ;;  %s134_s28 = sand.u32 1, %s1017_s10   ;;  %s812_s5 = sshll.u32 %s1070_s13, 8 }
  0x21   : > { %v595_v11 = vadd.s32 8, %v594_v9  ;;  %vm598_vm2 = vcmp.le.s32.totalorder %v597_v10, %v594_v9  ;;  %s752_s29 = sshll.u32 %s134_s28, 4  ;;  %s1267_s8 = scalar_lea.hbm %s1314_s2, %s812_s5 }
  0x22   : > { %503 = vmatpush1.bf16.msra.mxu1 %v929_v25  ;;  %s136_s3 = scalar_lea.vmem [#allocation2], %s752_s29  ;;  %s1271_s14 = scalar_lea.sflag [#allocation3], %s134_s28 }
  0x23   : > { %462 = vmatpush1.bf16.msra.mxu0 %v896_v18  ;;  %504 = vmatprep.subr.bf16.mxu1 %v933_v27  ;;  %vm599_vm4 = vcmp.le.s32.totalorder %v597_v10, %v595_v11  ;;  %s686_s4 = sshll.u32 %s136_s3, 4  ;;  %s1031_s16 = smov [#allocation2]   ;;  %s1262_s4 = int_to_ptr.vmem [resolvable:$true] %s686_s4 }
  0x24   : > { %463 = vmatprep.subr.bf16.mxu0 %v897_v20  ;;  %s963_s13 = scalar_lea.vmem %s1262_s4, 256  ;;  %s967_s17 = sshll.u32 %s1031_s16, 4  ;;  %s968_s17 = int_to_ptr.vmem [resolvable:$false] %s967_s17 }
  0x25   : > { %p964_p11 = scmp.ne.s32.totalorder %s1262_s4, %s963_s13  ;;  %s969_s21 = scalar_lea.vmem %s968_s17, 512 }
  0x26   : > { %505 = vmatpush1.bf16.msra.mxu1 %v935_v29  ;;  %p970_p0 = scmp.lt.s32.totalorder %s1262_s4, %s968_s17  ;;  %p971_p1 = scmp.lt.s32.totalorder %s969_s21, %s963_s13 }
  0x27   : > { %464 = vmatpush1.bf16.msra.mxu0 %v899_v22  ;;  %506 = vmatprep.subr.bf16.mxu1 %v939_v31  ;;  %p965_p12 = pnand %p964_p11, %p1087_p5 }
  0x28   : > { %465 = vmatprep.subr.bf16.mxu0 %v900_v24  ;;  %p972_p2 = por %p971_p1, %p970_p0 }
  0x29   : > { %p966_p13 = pneg %p965_p12 }
  0x2a   : > { %507 = vmatpush1.bf16.msra.mxu1 %v941_v33 }
  0x2b   : > { %466 = vmatpush1.bf16.msra.mxu0 %v902_v26  ;;  %508 = vmatprep.subr.bf16.mxu1 %v945_v36  ;;  %p973_p3 = pnand %p972_p2, %p966_p13 }
  0x2c   : > { %467 = vmatprep.subr.bf16.mxu0 %v906_v28 }
  0x2e   : > { %509 = vmatpush1.bf16.msra.mxu1 %v947_v38 }
  0x2f   : > { %468 = vmatpush1.bf16.msra.mxu0 %v908_v30  ;;  %817 = vmatprep.subr.bf16.mxu1 %v1028_v56 }
  0x30   : > { %469 = vmatprep.subr.bf16.mxu0 %v912_v32 }
  0x31   : > { %527 = vmatmul.mubr.bf16.vlgmr.msra.gmra.mrb[0].mxu1 %v951_v41 }
  0x32   : > { %819 = vmatprep.mubr.msk.bf16.mxu1 %vm1029_vm0, %v1028_v56 }
  0x33   : > { %470 = vmatpush1.bf16.msra.mxu0 %v914_v35 }
  0x34   : > { %471 = vmatprep.subr.bf16.mxu0 %v918_v37 }
  0x37   : > { %472 = vmatpush1.bf16.msra.mxu0 %v920_v39 }
  0x38   : > { %473 = vmatprep.subr.bf16.mxu0 %v924_v40 }
  0x3b   : > { %474 = vmatpush1.bf16.msra.mxu0 %v926_v42 }
  0x3c   : > { %475 = vmatprep.subr.bf16.mxu0 %v930_v43 }
  0x3f   : > { %476 = vmatpush1.bf16.msra.mxu0 %v932_v44 }
  0x40   : > { %477 = vmatprep.subr.bf16.mxu0 %v936_v45 }
  0x43   : > { %478 = vmatpush1.bf16.msra.mxu0 %v938_v46 }
  0x44   : > { %479 = vmatprep.subr.bf16.mxu0 %v942_v47 }
  0x47   : > { %480 = vmatpush1.bf16.msra.mxu0 %v944_v48 }
  0x48   : > { %481 = vmatprep.subr.bf16.mxu0 %v948_v49 }
  0x4b   : > { %482 = vmatpush1.bf16.msra.mxu0 %v950_v50 }
  0x4e   : > { %484 = vmatmul.mubr.bf16.vlgmr.msra.gmra.mrb[0].mxu0 %v952_v51 }
 0x104   : > { %v528_v52 = vpop.f32.mrb[0].mxu1 }
 0x105   : > { %v530_v53 = vpop.f32.mrb[1].mxu1 }
 0x106   : > { %v532_v54 = vpop.f32.mrb[2].mxu1 }
 0x107   : > { %v534_v55 = vpop.f32.mrb[3].mxu1 }
 0x121   : > { %v485_v57 = vpop.f32.mrb[0].mxu0 }
 0x122   : > { %v529_v58 = vadd.f32 %v528_v52, %v485_v57  ;;  %v487_v59 = vpop.f32.mrb[1].mxu0 }
 0x123   : > { %v531_v60 = vadd.f32 %v530_v53, %v487_v59  ;;  %v489_v61 = vpop.f32.mrb[2].mxu0 }
 0x124   : > { %v533_v62 = vadd.f32 %v532_v54, %v489_v61  ;;  %v491_v63 = vpop.f32.mrb[3].mxu0  ;;  %v537_v1 = vmul.f32 0.125, %v529_v58 }
 0x125   : > { %v535_v0 = vadd.f32 %v534_v55, %v491_v63 }
 0x126   : > { %v538_v2 = vmul.f32 0.125, %v533_v62  ;;  %v540_v3 = vpack.c.bf16 %v533_v62, %v529_v58 }
 0x127   : > { %v541_v4 = vpack.c.bf16 %v535_v0, %v531_v60 }
 0x128   : > { %v539_v5 = vpack.c.bf16 %v538_v2, %v537_v1  ;;  %543 = vrot.lane.b32.xlu0 %v540_v3, %s1030_s30 }
 0x19a   : > { %v544_v6 = vpop.permute.xlu0 %543 }
 0x19b   : > { %v550_v7 = vsel %vm545_vm1, %v544_v6, 0 }
 0x19c   : > { %818 = vmatpush3.bf16.xpose.msra.mxu1 %v550_v7 }
 0x19d   : > { %823 = vmatprep.subr.bf16.mxu1 %v1028_v56 }
 0x1a3   : > { %820 = vmatmul.mubr.msk.bf16.vlgmr.msra.gmra.mrb[4].mxu1 %vm545_vm1, %v539_v5 }
 0x1a4   : > { %824 = vmatpush3.bf16.msra.mxu1 %v541_v4  ;;  %825 = vmatprep.mubr.msk.bf16.mxu1 %vm1029_vm0, %v1028_v56 }
 0x276   : > { %v586_v12 = vpop.f32.mrb[4].mxu1 }
 0x277   : > { %v600_v13 = vsel %vm598_vm2, %v586_v12, -inf  ;;  %v821_v14 = vpop.f32.mrb[5].mxu1 }
 0x278   : > { %v589_v15 = vpop.f32.mrb[6].mxu1  ;;  %v603_v16 = vsel %vm602_vm3, %v600_v13, -inf }
 0x279   : > { %v601_v17 = vsel %vm599_vm4, %v589_v15, -inf  ;;  %604 = vmax.xlane.f32.xlu0 %v603_v16  ;;  %v822_v18 = vpop.f32.mrb[7].mxu1 }
 0x27a   : > { %v606_v19 = vsel %vm602_vm3, %v601_v17, -inf }
 0x27b   : > { %607 = vmax.xlane.f32.xlu1 %v606_v19 }
 0x306   : > { %v605_v20 = vpop.xlane.xlu0 %604 }
 0x307   : > { %v609_v21 = vsub.f32 %v600_v13, %v605_v20 }
 0x308   : > { %v608_v22 = vpop.xlane.xlu1 %607 }
 0x309   : > { %v611_v23 = vmul.f32 1.442695, %v609_v21  ;;  %v610_v24 = vsub.f32 %v601_v17, %v608_v22 }
 0x30b   : > { %955 = vpow2.f32 %v611_v23  ;;  %v613_v25 = vmul.f32 1.442695, %v610_v24 }
 0x30d   : > { %957 = vpow2.f32 %v613_v25 }
 0x315   : > { %v956_v26 = vpop.eup %955 }
 0x316   : > { %v615_v27 = vsel %vm602_vm3, %v956_v26, 0.0 }
 0x317   : > { %v958_v28 = vpop.eup %957  ;;  %616 = vadd.xlane.f32.xlu1 %v615_v27 }
 0x318   : > { %v618_v29 = vsel %vm602_vm3, %v958_v28, 0.0 }
 0x31b   : > { %619 = vadd.xlane.f32.xlu1 %v618_v29 }
 0x3a4   : > { %v617_v30 = vpop.xlane.xlu1 %616 }
 0x3a5   : > { %959 = vrcp.f32 %v617_v30 }
 0x3a8   : > { %v620_v31 = vpop.xlane.xlu1 %619 }
 0x3a9   : > { %961 = vrcp.f32 %v620_v31 }
 0x3af   : > { %v960_v32 = vpop.eup %959 }
 0x3b0   : > { %v623_v34 = vmul.f32 %v960_v32, %v956_v26 }
 0x3b3   : > { %v962_v33 = vpop.eup %961 }
 0x3b4   : > { %v624_v35 = vmul.f32 %v962_v33, %v958_v28 }
 0x3b6   : > { %v625_v36 = vpack.c.bf16 %v624_v35, %v623_v34 }
 0x3b8   : > { %826 = vmatmul.mubr.msk.bf16.vlgmr.msra.gmra.mrb[8].mxu1 %vm602_vm3, %v625_v36 }
 0x48b   : > { %v663_v37 = vpop.f32.mrb[8].mxu1 }
 0x48c   : > { %670 = vst.msk [vmem:[%s136_s3] sm:$0xff] %vm545_vm1, %v663_v37  ;;  %v827_v38 = vpop.f32.mrb[9].mxu1 }
 0x48d   : > { %v666_v39 = vpop.f32.mrb[10].mxu1 }
 0x48e   : > { %671 = vst.msk [vmem:[%s136_s3 + $0x8] sm:$0xff] %vm545_vm1, %v666_v39  ;;  %v828_v40 = vpop.f32.mrb[11].mxu1 }
 0x48f   : > { %976 = shalt.err (!%p973_p3)
}
 0x490   : > { %s977_s22 = scalar_lea.hbm %s1267_s8, 256  ;;  %s981_s25 = scalar_lea.hbm %s1314_s2, 512 }
 0x491   : > { %p978_p4 = scmp.ne.s32.totalorder %s1267_s8, %s977_s22  ;;  %p982_p9 = scmp.lt.u32.totalorder %s1267_s8, %s1314_s2 }
 0x492   : > { %p983_p10 = scmp.lt.u32.totalorder %s981_s25, %s977_s22  ;;  %p985_p12 = scmp.lt.u32.totalorder %s977_s22, %s1267_s8 }
 0x493   : > { %p979_p7 = pnand %p978_p4, %p1087_p5 }
 0x494   : > { %p984_p11 = por %p983_p10, %p982_p9 }
 0x495   : > { %p980_p8 = pneg %p979_p7 }
 0x496   : > { %p986_p13 = por %p985_p12, %p984_p11 }
 0x498   : > { %p987_p0 = pnand %p986_p13, %p980_p8 }
 0x49a   : > { %990 = shalt.err (!%p987_p0)
}
 0x49b   : > { %s1032_s30 = smov 128   ;;  %s1033_s28 = smov 8  }
 0x49c   : > { %834 = dma.vmem_to_hbm [thread:$0]  (%p1087_p5), %s1262_s4, 256, %s1267_s8, %s1271_s14, %s1032_s30, %s1032_s30, %s1033_s28  }
 0x49d PF: > { %p840_p1 = scmp.ge.s32.totalorder %s1025_s12, 2  ;;  %s701_s29 = sand.u32 1, %s1013_s9  }
 0x49e   : > { %s702_s3 = scalar_lea.sflag [#allocation3], %s701_s29 }
 0x49f   : > { %p837_p2 = pnand %p840_p1, %p1091_p6 }
 0x4a1   : > { %1008 = dma.done.wait (!%p837_p2), %s702_s3, 256  }
 0x4a2   : > { %1010 = vsyncadd (!%p837_p2), %s702_s3, 4294967040  ;;  %p12_p3 = scmp.ge.s32.totalorder %s1074_s15, 4   ;;  %s1317_s9 = smov %s1017_s10 }
 0x4a3   : > { %s1318_s10 = smov %s1021_s11  ;;  %s1319_s11 = smov %s1085_s18 }
 0x4a4   : > { %s1320_s12 = smov %s1074_s15  ;;  %14 = sbr.rel (!%p12_p3) target bundleno = 3 (0x3), region = 63 }
 0x4ab   :  { %707 = vsyncpa [#allocation3], 1 }
 0x4ac   :  { %709 = vsyncpa [#allocation3 + $0x1], 1 }

</bundles_post_ra>
